<compile_context>
chip_gen: v7x
topology: tpu7x:2x2x1
jax: 0.10.0
libtpu: 0.0.40
codegen_flags: <defaults>
</compile_context>

<pallas_src>
import numpy as np
import jax
import jax.numpy as jnp
from jax.experimental import pallas as pl
from jax.experimental.pallas import tpu as pltpu

# ---------------- Net buffer construction (matches PyTorch __init__) ----------

C_1 = 0.001
C_2 = 0.008
M = 1000
NOISE_SCHEDULE = "cosine"


def _alpha_bar(j):
    # cosine schedule, matches Net.alpha_bar
    return np.sin(0.5 * np.pi * j / M / (C_2 + 1.0)) ** 2


def build_u_buffer():
    u = np.zeros(M + 1, dtype=np.float64)
    for j in range(M, 0, -1):
        ratio = _alpha_bar(j - 1) / _alpha_bar(j)
        ratio = max(ratio, C_1)  # .clip(min=C_1)
        u[j - 1] = np.sqrt((u[j] ** 2 + 1.0) / ratio - 1.0)
    return u.astype(np.float32)


# ---------------- Pallas kernel ----------------------------------------------


def _net_kernel(x_ref, w1_ref, b1_ref, w2_ref, b2_ref, o_ref):
    """Single invocation: whole batch as one lane-dense (B*C, N) slab.

    x_ref  : VMEM (B*C, N)      raw input slab (kept for the skip path)
    w1_ref : VMEM (B*HID, B*C)  block-diagonal  c_in * W1^T
    b1_ref : VMEM (B*HID, 1)    b1 + emb[t], tiled over batch
    w2_ref : VMEM (B*C, B*HID)  block-diagonal  c_out * W2^T
    b2_ref : VMEM (B*C, 1)      c_out * b2, tiled over batch
    o_ref  : VMEM (B*C, N)      D_x = x + c_out * F_x
    """
    x = x_ref[...]                                                   # (B*C, N)

    # layer 1: one MXU call for the whole batch (block-diagonal weights)
    h = jnp.dot(w1_ref[...], x, preferred_element_type=jnp.float32)  # (B*HID, N)
    h = h + b1_ref[...]                                              # lane bcast

    # tanh-approx GELU (VPU/EUP only)
    c0 = jnp.float32(0.7978845608028654)                             # sqrt(2/pi)
    h = 0.5 * h * (1.0 + jnp.tanh(c0 * (h + 0.044715 * h * h * h)))

    # layer 2: one MXU call; c_out already folded into w2/b2
    f = jnp.dot(w2_ref[...], h, preferred_element_type=jnp.float32)  # (B*C, N)

    # D_x = c_skip * x + c_out * F_x   (c_skip == 1)
    o_ref[...] = x + f + b2_ref[...]


# ---------------- Wrapper ------------------------------------------------------


def prepare_static_params(params, B):
    """Sigma-independent prep, done ONCE at parameter-setup time."""
    C, HID = params["w1"].shape
    eye = jnp.eye(B, dtype=jnp.float32)
    w1t_bd = jnp.kron(eye, jnp.transpose(params["w1"]))   # (B*HID, B*C)
    w2t_bd = jnp.kron(eye, jnp.transpose(params["w2"]))   # (B*C, B*HID)
    b2_bd = jnp.tile(params["b2"][0], B).reshape(B * C, 1)
    return {
        "w1t_bd": w1t_bd,
        "w2t_bd": w2t_bd,
        "b2_bd": b2_bd,
        "b1": params["b1"][0],           # (HID,)
        "emb": params["emb"],            # (M, HID)
        "B": B, "C": C, "HID": HID,
    }


def net_forward(x_nchw, sigma_scalar, static, u_buf):
    """x_nchw: (B, C, H, W) f32.  sigma_scalar: () f32 scalar.  Returns D_x NCHW."""
    B, C, H, W = x_nchw.shape
    N = H * W
    HID = static["HID"]
    assert jnp.ndim(sigma_scalar) == 0, "scalar sigma assumed (see header note)"

    sigma = sigma_scalar.astype(jnp.float32)

    # --- sigma-dependent glue (tiny, per-call) --------------------------------
    c_in = jax.lax.rsqrt(sigma * sigma + 1.0)       # 1 / sqrt(sigma^2 + 1)
    c_out = -sigma                                  # c_skip == 1

    # round_sigma(return_index=True): index = argmin_j |sigma - u[j]|
    idx = jnp.argmin(jnp.abs(sigma - u_buf)).astype(jnp.int32)
    t_idx = jnp.clip((M - 1) - idx, 0, M - 1)

    bias1 = static["b1"] + static["emb"][t_idx]                 # (HID,)
    bias1_bd = jnp.tile(bias1, B).reshape(B * HID, 1)           # (B*HID, 1)
    w1s = c_in * static["w1t_bd"]                               # (B*HID, B*C)
    w2s = c_out * static["w2t_bd"]                              # (B*C, B*HID)
    b2s = c_out * static["b2_bd"]                               # (B*C, 1)

    # --- layout: NCHW is contiguous as (B*C, N) -> pure reshape, no transpose --
    x_slab = x_nchw.reshape(B * C, N).astype(jnp.float32)

    # TODO(synk): at real resolutions (N >> 10^3) add a pixel-tile grid axis and
    # size blocks for v7x's 64 MiB VMEM (vmem_limit_bytes); irrelevant here.
    out_slab = pl.pallas_call(
        _net_kernel,
        out_shape=jax.ShapeDtypeStruct((B * C, N), jnp.float32),
        in_specs=[pl.BlockSpec(memory_space=pltpu.MemorySpace.VMEM)] * 5,
        out_specs=pl.BlockSpec(memory_space=pltpu.MemorySpace.VMEM),
    )(x_slab, w1s, bias1_bd, w2s, b2s)

    return out_slab.reshape(B, C, H, W)


# ---------------- Pure-JAX reference (for verification) -----------------------


def net_forward_ref(x_nchw, sigma_scalar, params, u_buf):
    B, C, H, W = x_nchw.shape
    sigma = sigma_scalar.astype(jnp.float32)
    c_in = 1.0 / jnp.sqrt(sigma ** 2 + 1.0)
    c_out = -sigma
    idx = jnp.argmin(jnp.abs(sigma - u_buf)).astype(jnp.int32)
    t_idx = jnp.clip((M - 1) - idx, 0, M - 1)
    temb = params["emb"][t_idx]                              # (HID,)

    x_bnc = jnp.transpose(x_nchw, (0, 2, 3, 1)).reshape(B, H * W, C)
    x_in = c_in * x_bnc
    h = x_in @ params["w1"] + params["b1"] + temb[None, None, :]
    c0 = 0.7978845608028654
    h = 0.5 * h * (1.0 + jnp.tanh(c0 * (h + 0.044715 * h ** 3)))
    f_x = h @ params["w2"] + params["b2"]
    d_x = x_bnc + c_out * f_x
    return jnp.transpose(d_x.reshape(B, H, W, C), (0, 3, 1, 2))


# ---------------- Main ---------------------------------------------------------

if __name__ == "__main__":
    B, C, H, W = 2, 4, 16, 16
    HID = 32

    u_np = build_u_buffer()
    u_buf = jnp.asarray(u_np)

    key = jax.random.PRNGKey(0)
    k_x, k_w1, k_b1, k_w2, k_b2, k_e = jax.random.split(key, 6)

    params = {
        "w1": jax.random.normal(k_w1, (C, HID), jnp.float32) * 0.2,
        "b1": jax.random.normal(k_b1, (1, HID), jnp.float32) * 0.1,
        "w2": jax.random.normal(k_w2, (HID, C), jnp.float32) * 0.2,
        "b2": jax.random.normal(k_b2, (1, C), jnp.float32) * 0.1,
        "emb": jax.random.normal(k_e, (M, HID), jnp.float32) * 0.1,
    }

    static = prepare_static_params(params, B)   # sigma-independent, done once

    x = jax.random.normal(k_x, (B, C, H, W), jnp.float32)
    sigma = jnp.float32(2.5)  # scalar sigma in (sigma_min, sigma_max)

    out = jax.block_until_ready(net_forward(x, sigma, static, u_buf))
    ref = jax.block_until_ready(net_forward_ref(x, sigma, params, u_buf))

    assert out.shape == (B, C, H, W) and out.dtype == jnp.float32
    np_out = np.asarray(out)
    np_ref = np.asarray(ref)
    assert np.allclose(np_out, np_ref, rtol=1e-5, atol=1e-5), (
        np.abs(np_out - np_ref).max())

    print("KERNEL_OK")
</pallas_src>

<mosaic_0001>
module attributes {stable_mosaic.version = 11 : i64} {
  func.func @_net_kernel(%arg0: memref<8x256xf32, #tpu.memory_space<vmem>>, %arg1: memref<64x8xf32, #tpu.memory_space<vmem>>, %arg2: memref<64x1xf32, #tpu.memory_space<vmem>>, %arg3: memref<8x64xf32, #tpu.memory_space<vmem>>, %arg4: memref<8x1xf32, #tpu.memory_space<vmem>>, %arg5: memref<8x256xf32, #tpu.memory_space<vmem>>) attributes {dimension_semantics = [], scalar_prefetch = 0 : i64, scratch_operands = 0 : i64, tpu.core_type = #tpu.core_type<tc>} {
    %c0 = arith.constant 0 : index
    %c0_0 = arith.constant 0 : index
    %0 = vector.load %arg0[%c0, %c0_0] : memref<8x256xf32, #tpu.memory_space<vmem>>, vector<8x256xf32>
    %c0_1 = arith.constant 0 : index
    %c0_2 = arith.constant 0 : index
    %1 = vector.load %arg1[%c0_1, %c0_2] : memref<64x8xf32, #tpu.memory_space<vmem>>, vector<64x8xf32>
    %cst = arith.constant dense<0.000000e+00> : vector<64x256xf32>
    %2 = tpu.matmul %1, %0, %cst {dimension_numbers = #tpu.dot_dimension_numbers<[1], [0], [0], [1], [0, 0, 1, 1], [], []>} : vector<64x8xf32>, vector<8x256xf32>, vector<64x256xf32> -> vector<64x256xf32>
    %c0_3 = arith.constant 0 : index
    %c0_4 = arith.constant 0 : index
    %3 = vector.load %arg2[%c0_3, %c0_4] : memref<64x1xf32, #tpu.memory_space<vmem>>, vector<64x1xf32>
    %4 = vector.broadcast %3 : vector<64x1xf32> to vector<64x256xf32>
    %5 = arith.addf %2, %4 : vector<64x256xf32>
    %cst_5 = arith.constant 5.000000e-01 : f32
    %6 = vector.broadcast %cst_5 : f32 to vector<64x256xf32>
    %7 = arith.mulf %6, %5 : vector<64x256xf32>
    %cst_6 = arith.constant 4.471500e-02 : f32
    %8 = vector.broadcast %cst_6 : f32 to vector<64x256xf32>
    %9 = arith.mulf %8, %5 : vector<64x256xf32>
    %10 = arith.mulf %9, %5 : vector<64x256xf32>
    %11 = arith.mulf %10, %5 : vector<64x256xf32>
    %12 = arith.addf %5, %11 : vector<64x256xf32>
    %cst_7 = arith.constant 0.797884583 : f32
    %13 = vector.broadcast %cst_7 : f32 to vector<64x256xf32>
    %14 = arith.mulf %13, %12 : vector<64x256xf32>
    %15 = math.tanh %14 : vector<64x256xf32>
    %cst_8 = arith.constant 1.000000e+00 : f32
    %16 = vector.broadcast %cst_8 : f32 to vector<64x256xf32>
    %17 = arith.addf %16, %15 : vector<64x256xf32>
    %18 = arith.mulf %7, %17 : vector<64x256xf32>
    %c0_9 = arith.constant 0 : index
    %c0_10 = arith.constant 0 : index
    %19 = vector.load %arg3[%c0_9, %c0_10] : memref<8x64xf32, #tpu.memory_space<vmem>>, vector<8x64xf32>
    %cst_11 = arith.constant dense<0.000000e+00> : vector<8x256xf32>
    %20 = tpu.matmul %19, %18, %cst_11 {dimension_numbers = #tpu.dot_dimension_numbers<[1], [0], [0], [1], [0, 0, 1, 1], [], []>} : vector<8x64xf32>, vector<64x256xf32>, vector<8x256xf32> -> vector<8x256xf32>
    %21 = arith.addf %0, %20 : vector<8x256xf32>
    %c0_12 = arith.constant 0 : index
    %c0_13 = arith.constant 0 : index
    %22 = vector.load %arg4[%c0_12, %c0_13] : memref<8x1xf32, #tpu.memory_space<vmem>>, vector<8x1xf32>
    %23 = vector.broadcast %22 : vector<8x1xf32> to vector<8x256xf32>
    %24 = arith.addf %21, %23 : vector<8x256xf32>
    %c0_14 = arith.constant 0 : index
    %c0_15 = arith.constant 0 : index
    %25 = vector.load %arg5[%c0_14, %c0_15] : memref<8x256xf32, #tpu.memory_space<vmem>>, vector<8x256xf32>
    tpu.vector_store %arg5[%c0_14, %c0_15], %24 {strides = array<i32>} : memref<8x256xf32, #tpu.memory_space<vmem>>, vector<8x256xf32>,
    return
  }
}

</mosaic_0001>

<bundles_post_ra>
// kernel: tpu_custom_call.1
= control target key start
LH: loop header
LB: loop body
LE: loop exit
PB: predicated region body
PF: predicated region fallthrough
CT: control target
= control target key end

     0   :  { %vm79_vm0 = vcmask 64512   ;;  %v549_v3 = vmov 0.0   ;;  %v550_v4 = vmov 0   ;;  %s768_s0 = inlined_call_operand.vmem [shape: f32[8,256], index: 0, kind: input, shape index: {}]   ;;  %s769_s1 = inlined_call_operand.vmem [shape: f32[64,8], index: 1, kind: input, shape index: {}]   ;;  %s770_s2 = inlined_call_operand.vmem [shape: f32[64,1], index: 2, kind: input, shape index: {}]   ;;  %s771_s3 = inlined_call_operand.vmem [shape: f32[8,64], index: 3, kind: input, shape index: {}]   ;;  %s772_s4 = inlined_call_operand.vmem [shape: f32[8,1], index: 4, kind: input, shape index: {}]   ;;  %s773_s5 = inlined_call_operand.hbm [shape: f32[8,256], index: 5, kind: output, shape index: {}]  }
   0x1   :  { %v585_v0 = vld [vmem:[%s768_s0 + $0x8] sm:$0xff]  ;;  %v590_v1 = vld [vmem:[%s768_s0] sm:$0xff]  ;;  %168 = vmatprep.mubr.f32.mxu0 %v549_v3  ;;  %491 = vset.pattern.permute.xlu0 %v550_v4  ;;  %v33_v7 = vld [vmem:[%s770_s2 + $0x10] sm:$0xff] }
   0x2   :  { %v23_v2 = vld [vmem:[%s769_s1] sm:$0xff]  ;;  %104 = vmatprep.subr.mxu0 %v585_v0  ;;  %492 = vset.pattern.permute.xlu1 %v550_v4  ;;  %v24_v6 = vld [vmem:[%s769_s1 + $0x8] sm:$0xff]  ;;  %v34_v9 = vld [vmem:[%s770_s2 + $0x18] sm:$0xff] }
   0x3   :  { %105 = vmatpush1.msra.mxu0 %v590_v1  ;;  %v31_v5 = vld [vmem:[%s770_s2] sm:$0xff]  ;;  %v32_v8 = vld [vmem:[%s770_s2 + $0x8] sm:$0xff]  ;;  %51 = vperm.xlu1 %492, %v33_v7  }
   0x4   :  { %463 = vmatmul.mubr.msk.f32.vlgmr.msra.gmra.mrb[0].mxu0 %vm79_vm0, %v23_v2  ;;  %41 = vperm.xlu0 %491, %v31_v5  }
   0x5   :  { %174 = vmatprep.mubr.f32.mxu0 %v549_v3  ;;  %430 = vmatprep.mubr.f32.mxu1 %v549_v3 }
   0x6   :  { %10 = vsyncpa [#allocation3], 0  ;;  %v25_v10 = vld [vmem:[%s769_s1 + $0x10] sm:$0xff]  ;;  %v35_v11 = vld [vmem:[%s770_s2 + $0x20] sm:$0xff]  ;;  %vm362_vm1 = vcmask 523264   ;;  %s551_s28 = smov [#allocation2]  }
   0x7   :  { %56 = vperm.xlu1 %492, %v34_v9   ;;  %v36_v12 = vld [vmem:[%s770_s2 + $0x28] sm:$0xff]  ;;  %v26_v13 = vld [vmem:[%s769_s1 + $0x18] sm:$0xff]  ;;  %v37_v14 = vld [vmem:[%s770_s2 + $0x30] sm:$0xff]  ;;  %s455_s29 = sshll.u32 %s551_s28, 4  ;;  %s456_s29 = int_to_ptr.vmem [resolvable:$true] %s455_s29 }
   0x8   :  { %464 = vmatmul.mubr.msk.f32.gmra.mrb[2].mxu0 %vm79_vm0, %v24_v6  ;;  %46 = vperm.xlu0 %491, %v32_v8   ;;  %v38_v15 = vld [vmem:[%s770_s2 + $0x38] sm:$0xff]  ;;  %v27_v16 = vld [vmem:[%s769_s1 + $0x20] sm:$0xff]  ;;  %v28_v18 = vld [vmem:[%s769_s1 + $0x28] sm:$0xff]  ;;  %s525_s30 = scalar_lea.vmem %s456_s29, 256  ;;  %p530_p1 = scmp.lt.s32.totalorder %s456_s29, %s456_s29 }
   0x9   :  { %180 = vmatprep.mubr.f32.mxu0 %v549_v3  ;;  %v439_v17 = vld [vmem:[%s772_s4] sm:$0xff]  ;;  %v29_v19 = vld [vmem:[%s769_s1 + $0x30] sm:$0xff]  ;;  %v30_v20 = vld [vmem:[%s769_s1 + $0x38] sm:$0xff]  ;;  %p526_p0 = scmp.ne.s32.totalorder %s456_s29, %s525_s30  ;;  %p531_p2 = scmp.lt.s32.totalorder %s525_s30, %s525_s30 }
   0xb   :  { %66 = vperm.xlu1 %492, %v36_v12   ;;  %p532_p3 = por %p531_p2, %p530_p1 }
   0xc   :  { %465 = vmatmul.mubr.msk.f32.gmra.mrb[4].mxu0 %vm79_vm0, %v25_v10  ;;  %61 = vperm.xlu0 %491, %v35_v11  }
   0xd   :  { %186 = vmatprep.mubr.f32.mxu0 %v549_v3  ;;  %p533_p4 = pnand %p532_p3, %p526_p0 }
   0xf   :  { %76 = vperm.xlu1 %492, %v38_v15  }
  0x10   :  { %466 = vmatmul.mubr.msk.f32.gmra.mrb[6].mxu0 %vm79_vm0, %v26_v13  ;;  %71 = vperm.xlu0 %491, %v37_v14  }
  0x11   :  { %192 = vmatprep.mubr.f32.mxu0 %v549_v3 }
  0x14   :  { %467 = vmatmul.mubr.msk.f32.gmra.mrb[8].mxu0 %vm79_vm0, %v27_v16  ;;  %442 = vperm.xlu0 %491, %v439_v17  }
  0x15   :  { %198 = vmatprep.mubr.f32.mxu0 %v549_v3 }
  0x18   :  { %468 = vmatmul.mubr.msk.f32.gmra.mrb[10].mxu0 %vm79_vm0, %v28_v18 }
  0x19   :  { %204 = vmatprep.mubr.f32.mxu0 %v549_v3 }
  0x1c   :  { %469 = vmatmul.mubr.msk.f32.gmra.mrb[12].mxu0 %vm79_vm0, %v29_v19 }
  0x1d   :  { %210 = vmatprep.mubr.f32.mxu0 %v549_v3 }
  0x20   :  { %470 = vmatmul.mubr.msk.f32.gmra.mrb[14].mxu0 %vm79_vm0, %v30_v20 }
  0x82   :  { %v52_v33 = vpop.permute.xlu1 %51 }
  0x83   :  { %v42_v21 = vpop.permute.xlu0 %41 }
  0x86   :  { %v57_v51 = vpop.permute.xlu1 %56 }
  0x87   :  { %v47_v27 = vpop.permute.xlu0 %46 }
  0x8a   :  { %v67_v20 = vpop.permute.xlu1 %66 }
  0x8b   :  { %v62_v4 = vpop.permute.xlu0 %61 }
  0xd7   :  { %v170_v22 = vpop.f32.mrb[0].mxu0 }
  0xd8   :  { %v171_v23 = vadd.f32 %v170_v22, %v42_v21  ;;  %v172_v24 = vpop.f32.mrb[1].mxu0 }
  0xd9   :  { %v653_v25 = vadd.f32 %v172_v24, %v42_v21 }
  0xda   :  { %v233_v26 = vmul.f32 0.044715, %v171_v23  ;;  %v217_v18 = vmul.f32 0.5, %v171_v23 }
  0xdb   :  { %v234_v28 = vmul.f32 0.044715, %v653_v25  ;;  %v176_v29 = vpop.f32.mrb[2].mxu0 }
  0xdc   :  { %v249_v30 = vmul.f32 %v233_v26, %v171_v23  ;;  %v177_v31 = vadd.f32 %v176_v29, %v47_v27  ;;  %v178_v32 = vpop.f32.mrb[3].mxu0  ;;  %v218_v26 = vmul.f32 0.5, %v653_v25 }
  0xdd   :  { %v656_v34 = vadd.f32 %v178_v32, %v47_v27  ;;  %v250_v35 = vmul.f32 %v234_v28, %v653_v25 }
  0xde   :  { %v235_v36 = vmul.f32 0.044715, %v177_v31  ;;  %v265_v37 = vmul.f32 %v249_v30, %v171_v23  ;;  %v219_v30 = vmul.f32 0.5, %v177_v31 }
  0xdf   :  { %v236_v38 = vmul.f32 0.044715, %v656_v34  ;;  %v182_v39 = vpop.f32.mrb[4].mxu0  ;;  %v266_v40 = vmul.f32 %v250_v35, %v653_v25 }
  0xe0   :  { %v251_v41 = vmul.f32 %v235_v36, %v177_v31  ;;  %v661_v42 = vadd.f32 %v182_v39, %v52_v33  ;;  %v184_v43 = vpop.f32.mrb[5].mxu0  ;;  %v281_v44 = vadd.f32 %v265_v37, %v171_v23 }
  0xe1   :  { %v663_v45 = vadd.f32 %v184_v43, %v52_v33  ;;  %v252_v46 = vmul.f32 %v236_v38, %v656_v34  ;;  %v282_v47 = vadd.f32 %v266_v40, %v653_v25  ;;  %v220_v38 = vmul.f32 0.5, %v656_v34 }
  0xe2   :  { %v237_v48 = vmul.f32 0.044715, %v661_v42  ;;  %v267_v49 = vmul.f32 %v251_v41, %v177_v31  ;;  %v297_v50 = vmul.f32 0.7978846, %v281_v44 }
  0xe3   :  { %v238_v52 = vmul.f32 0.044715, %v663_v45  ;;  %v188_v53 = vpop.f32.mrb[6].mxu0  ;;  %v268_v54 = vmul.f32 %v252_v46, %v656_v34  ;;  %v298_v55 = vmul.f32 0.7978846, %v282_v47 }
  0xe4   :  { %v253_v56 = vmul.f32 %v237_v48, %v661_v42  ;;  %v671_v57 = vadd.f32 %v188_v53, %v57_v51  ;;  %v190_v58 = vpop.f32.mrb[7].mxu0  ;;  %v283_v59 = vadd.f32 %v267_v49, %v177_v31  ;;  %493 = vtanh.f32 %v297_v50  ;;  %v72_v31 = vpop.permute.xlu0 %71 }
  0xe5   :  { %v254_v60 = vmul.f32 %v238_v52, %v663_v45  ;;  %v674_v61 = vadd.f32 %v190_v58, %v57_v51  ;;  %v284_v62 = vadd.f32 %v268_v54, %v656_v34  ;;  %495 = vtanh.f32 %v298_v55 }
  0xe6   :  { %v269_v63 = vmul.f32 %v253_v56, %v661_v42  ;;  %v239_v2 = vmul.f32 0.044715, %v671_v57  ;;  %v299_v3 = vmul.f32 0.7978846, %v283_v59  ;;  %v221_v53 = vmul.f32 0.5, %v661_v42 }
  0xe7   :  { %v270_v5 = vmul.f32 %v254_v60, %v663_v45  ;;  %v240_v6 = vmul.f32 0.044715, %v674_v61  ;;  %v194_v7 = vpop.f32.mrb[8].mxu0  ;;  %v300_v8 = vmul.f32 0.7978846, %v284_v62  ;;  %v77_v62 = vpop.permute.xlu1 %76 }
  0xe8   :  { %v255_v9 = vmul.f32 %v239_v2, %v671_v57  ;;  %v682_v10 = vadd.f32 %v194_v7, %v62_v4  ;;  %v196_v11 = vpop.f32.mrb[9].mxu0  ;;  %497 = vtanh.f32 %v299_v3  ;;  %v285_v12 = vadd.f32 %v269_v63, %v661_v42 }
  0xe9   :  { %v256_v13 = vmul.f32 %v240_v6, %v674_v61  ;;  %v686_v14 = vadd.f32 %v196_v11, %v62_v4  ;;  %499 = vtanh.f32 %v300_v8  ;;  %v286_v15 = vadd.f32 %v270_v5, %v663_v45 }
  0xea   :  { %v271_v16 = vmul.f32 %v255_v9, %v671_v57  ;;  %v241_v17 = vmul.f32 0.044715, %v682_v10  ;;  %v301_v19 = vmul.f32 0.7978846, %v285_v12 }
  0xeb   :  { %v272_v21 = vmul.f32 %v256_v13, %v674_v61  ;;  %v242_v22 = vmul.f32 0.044715, %v686_v14  ;;  %v200_v24 = vpop.f32.mrb[10].mxu0  ;;  %v302_v27 = vmul.f32 0.7978846, %v286_v15 }
  0xec   :  { %v694_v28 = vadd.f32 %v200_v24, %v67_v20  ;;  %v202_v29 = vpop.f32.mrb[11].mxu0  ;;  %v287_v32 = vadd.f32 %v271_v16, %v671_v57  ;;  %501 = vtanh.f32 %v301_v19  ;;  %v257_v37 = vmul.f32 %v241_v17, %v682_v10 }
  0xed   :  { %v258_v33 = vmul.f32 %v242_v22, %v686_v14  ;;  %v698_v23 = vadd.f32 %v202_v29, %v67_v20  ;;  %v288_v35 = vadd.f32 %v272_v21, %v674_v61  ;;  %503 = vtanh.f32 %v302_v27 }
  0xee   :  { %v494_v36 = vpop.eup %493  ;;  %v243_v25 = vmul.f32 0.044715, %v694_v28  ;;  %v303_v39 = vmul.f32 0.7978846, %v287_v32  ;;  %v273_v55 = vmul.f32 %v257_v37, %v682_v10  ;;  %v223_v27 = vmul.f32 0.5, %v671_v57 }
  0xef   :  { %v496_v40 = vpop.eup %495  ;;  %v274_v41 = vmul.f32 %v258_v33, %v686_v14  ;;  %v244_v43 = vmul.f32 0.044715, %v698_v23  ;;  %v206_v44 = vpop.f32.mrb[12].mxu0  ;;  %v329_v46 = vadd.f32 1.0, %v494_v36  ;;  %v304_v47 = vmul.f32 0.7978846, %v288_v35 }
  0xf0   :  { %v259_v48 = vmul.f32 %v243_v25, %v694_v28  ;;  %v707_v49 = vadd.f32 %v206_v44, %v72_v31  ;;  %v208_v50 = vpop.f32.mrb[13].mxu0  ;;  %v330_v51 = vadd.f32 1.0, %v496_v40  ;;  %505 = vtanh.f32 %v303_v39 }
  0xf1   :  { %v260_v52 = vmul.f32 %v244_v43, %v698_v23  ;;  %v710_v34 = vadd.f32 %v208_v50, %v72_v31  ;;  %507 = vtanh.f32 %v304_v47  ;;  %v345_v59 = vmul.f32 %v329_v46, %v217_v18 }
  0xf2   :  { %v498_v54 = vpop.eup %497  ;;  %v275_v56 = vmul.f32 %v259_v48, %v694_v28  ;;  %v245_v58 = vmul.f32 0.044715, %v707_v49  ;;  %v290_v5 = vadd.f32 %v274_v41, %v686_v14  ;;  %v346_v9 = vmul.f32 %v330_v51, %v218_v26 }
  0xf3   :  { %v500_v60 = vpop.eup %499  ;;  %v276_v63 = vmul.f32 %v260_v52, %v698_v23  ;;  %v246_v2 = vmul.f32 0.044715, %v710_v34  ;;  %v212_v3 = vpop.f32.mrb[14].mxu0  ;;  %v331_v4 = vadd.f32 1.0, %v498_v54  ;;  %v289_v20 = vadd.f32 %v273_v55, %v682_v10 }
  0xf4   :  { %v261_v42 = vmul.f32 %v245_v58, %v707_v49  ;;  %v720_v6 = vadd.f32 %v212_v3, %v77_v62  ;;  %v214_v7 = vpop.f32.mrb[15].mxu0  ;;  %v332_v8 = vadd.f32 1.0, %v500_v60  ;;  %v306_v19 = vmul.f32 0.7978846, %v290_v5 }
  0xf5   :  { %v262_v11 = vmul.f32 %v246_v2, %v710_v34  ;;  %v723_v12 = vadd.f32 %v214_v7, %v77_v62  ;;  %v347_v13 = vmul.f32 %v331_v4, %v219_v30  ;;  %v292_v15 = vadd.f32 %v276_v63, %v698_v23 }
  0xf6   :  { %v502_v16 = vpop.eup %501  ;;  %v247_v17 = vmul.f32 0.044715, %v720_v6  ;;  %v348_v18 = vmul.f32 %v332_v8, %v220_v38  ;;  %v222_v26 = vmul.f32 0.5, %v663_v45  ;;  %509 = vtanh.f32 %v306_v19 }
  0xf7   :  { %v504_v21 = vpop.eup %503  ;;  %v248_v22 = vmul.f32 0.044715, %v723_v12  ;;  %v474_v24 = vpack.c.bf16 %v347_v13, %v345_v59  ;;  %v278_v29 = vmul.f32 %v262_v11, %v710_v34  ;;  %v308_v33 = vmul.f32 0.7978846, %v292_v15 }
  0xf8   :  { %v263_v30 = vmul.f32 %v247_v17, %v720_v6  ;;  %v472_v32 = vpack.c.bf16 %v348_v18, %v346_v9  ;;  %v333_v36 = vadd.f32 1.0, %v502_v16  ;;  %v291_v37 = vadd.f32 %v275_v56, %v694_v28 }
  0xf9   :  { %v264_v35 = vmul.f32 %v248_v22, %v723_v12  ;;  %v277_v38 = vmul.f32 %v261_v42, %v707_v49  ;;  %v334_v39 = vadd.f32 1.0, %v504_v21  ;;  %511 = vtanh.f32 %v308_v33 }
  0xfa   :  { %v506_v25 = vpop.eup %505  ;;  %473 = vmatprep.subr.bf16.mxu1 %v472_v32  ;;  %v305_v45 = vmul.f32 0.7978846, %v289_v20  ;;  %v279_v40 = vmul.f32 %v263_v30, %v720_v6  ;;  %v307_v43 = vmul.f32 0.7978846, %v291_v37  ;;  %v224_v44 = vmul.f32 0.5, %v674_v61 }
  0xfb   :  { %v508_v57 = vpop.eup %507  ;;  %v280_v31 = vmul.f32 %v264_v35, %v723_v12  ;;  %475 = vmatpush1.bf16.msra.mxu1 %v474_v24  ;;  %v335_v41 = vadd.f32 1.0, %v506_v25  ;;  %v294_v47 = vadd.f32 %v278_v29, %v710_v34  ;;  %v349_v48 = vmul.f32 %v333_v36, %v221_v53 }
  0xfc   :  { %v336_v46 = vadd.f32 1.0, %v508_v57  ;;  %513 = vtanh.f32 %v305_v45  ;;  %v350_v52 = vmul.f32 %v334_v39, %v222_v26  ;;  %v293_v56 = vadd.f32 %v277_v38, %v707_v49 }
  0xfd   :  { %v351_v50 = vmul.f32 %v335_v41, %v223_v27  ;;  %515 = vtanh.f32 %v307_v43  ;;  %v296_v51 = vadd.f32 %v280_v31, %v723_v12  ;;  %v310_v55 = vmul.f32 0.7978846, %v294_v47 }
  0xfe   :  { %v352_v54 = vmul.f32 %v336_v46, %v224_v44  ;;  %v295_v60 = vadd.f32 %v279_v40, %v720_v6  ;;  %v309_v61 = vmul.f32 0.7978846, %v293_v56  ;;  %v226_v4 = vmul.f32 0.5, %v686_v14 }
  0xff   :  { %v478_v58 = vpack.c.bf16 %v351_v50, %v349_v48  ;;  %v312_v59 = vmul.f32 0.7978846, %v296_v51  ;;  %517 = vtanh.f32 %v310_v55  ;;  %v228_v5 = vmul.f32 0.5, %v698_v23 }
 0x100   :  { %v476_v62 = vpack.c.bf16 %v352_v54, %v350_v52  ;;  %v311_v63 = vmul.f32 0.7978846, %v295_v60  ;;  %v510_v53 = vpop.eup %509  ;;  %v225_v15 = vmul.f32 0.5, %v682_v10  ;;  %v227_v16 = vmul.f32 0.5, %v694_v28 }
 0x101   :  { %519 = vtanh.f32 %v312_v59  ;;  %v338_v3 = vadd.f32 1.0, %v510_v53  ;;  %v230_v26 = vmul.f32 0.5, %v710_v34  ;;  %v232_v27 = vmul.f32 0.5, %v723_v12  ;;  %v361_v34 = vld [vmem:[%s771_s3] sm:$0xff] }
 0x102   :  { %477 = vmatprep.subr.bf16.mxu1 %v476_v62  ;;  %521 = vtanh.f32 %v309_v61  ;;  %v229_v10 = vmul.f32 0.5, %v707_v49  ;;  %v231_v35 = vmul.f32 0.5, %v720_v6  ;;  %v443_v6 = vpop.permute.xlu0 %442 }
 0x103   :  { %479 = vmatpush1.bf16.msra.mxu1 %v478_v58  ;;  %523 = vtanh.f32 %v311_v63  ;;  %v512_v2 = vpop.eup %511  ;;  %v354_v9 = vmul.f32 %v338_v3, %v226_v4 }
 0x104   :  { %v340_v42 = vadd.f32 1.0, %v512_v2 }
 0x106   :  { %v514_v7 = vpop.eup %513  ;;  %v356_v11 = vmul.f32 %v340_v42, %v228_v5 }
 0x107   :  { %v516_v8 = vpop.eup %515  ;;  %v337_v13 = vadd.f32 1.0, %v514_v7 }
 0x108   :  { %v339_v17 = vadd.f32 1.0, %v516_v8  ;;  %v480_v18 = vpack.c.bf16 %v356_v11, %v354_v9 }
 0x109   :  { %v518_v19 = vpop.eup %517  ;;  %v353_v20 = vmul.f32 %v337_v13, %v225_v15 }
 0x10a   :  { %v355_v21 = vmul.f32 %v339_v17, %v227_v16  ;;  %481 = vmatprep.subr.bf16.mxu1 %v480_v18  ;;  %v342_v14 = vadd.f32 1.0, %v518_v19 }
 0x10b   :  { %v520_v22 = vpop.eup %519 }
 0x10c   :  { %v522_v24 = vpop.eup %521  ;;  %v482_v23 = vpack.c.bf16 %v355_v21, %v353_v20  ;;  %v344_v29 = vadd.f32 1.0, %v520_v22  ;;  %v358_v28 = vmul.f32 %v342_v14, %v230_v26 }
 0x10d   :  { %v524_v30 = vpop.eup %523  ;;  %v341_v32 = vadd.f32 1.0, %v522_v24 }
 0x10e   :  { %483 = vmatpush1.bf16.msra.mxu1 %v482_v23  ;;  %v360_v33 = vmul.f32 %v344_v29, %v232_v27  ;;  %v343_v36 = vadd.f32 1.0, %v524_v30 }
 0x10f   :  { %v357_v25 = vmul.f32 %v341_v32, %v229_v10 }
 0x110   :  { %v484_v37 = vpack.c.bf16 %v360_v33, %v358_v28  ;;  %v359_v38 = vmul.f32 %v343_v36, %v231_v35 }
 0x112   :  { %485 = vmatprep.subr.bf16.mxu1 %v484_v37  ;;  %v486_v39 = vpack.c.bf16 %v359_v38, %v357_v25 }
 0x114   :  { %487 = vmatpush1.bf16.msra.mxu1 %v486_v39 }
 0x117   :  { %471 = vmatmul.mubr.msk.f32.vlgmr.msra.gmra.mrb[0].mxu1 %vm362_vm1, %v361_v34 }
 0x1ea   :  { %v432_v49 = vpop.f32.mrb[0].mxu1 }
 0x1eb   :  { %v437_v12 = vadd.f32 %v432_v49, %v590_v1  ;;  %v434_v45 = vpop.f32.mrb[1].mxu1 }
 0x1ec   :  { %v438_v57 = vadd.f32 %v434_v45, %v585_v0 }
 0x1ed   :  { %v445_v40 = vadd.f32 %v443_v6, %v437_v12 }
 0x1ee   :  { %v446_v31 = vadd.f32 %v443_v6, %v438_v57 }
 0x1ef   :  { %447 = vst [vmem:[#allocation2] sm:$0xff] %v445_v40 }
 0x1f0   :  { %448 = vst [vmem:[#allocation2 + $0x8] sm:$0xff] %v446_v31 }
 0x1f1   :  { %536 = shalt.err (!%p533_p4)
}
 0x1f2   :  { %s537_s7 = scalar_lea.hbm %s773_s5, 256 }
 0x1f3   :  { %p538_p5 = scmp.ne.s32.totalorder %s773_s5, %s537_s7  ;;  %p541_p6 = scmp.lt.u32.totalorder %s537_s7, %s773_s5 }
 0x1f5   :  { %p543_p7 = pnand %p541_p6, %p538_p5 }
 0x1f7   :  { %546 = shalt.err (!%p543_p7)
}
 0x1f8   :  { %458 = dma.vmem_to_hbm [thread:$0]  %s456_s29, 256, %s773_s5, [#allocation3]  }
 0x1f9   :  { %547 = dma.done.wait [#allocation3], 256  }
 0x1fa   :  { %548 = vsyncadd [#allocation3], 4294967040 }
 0x1fb   :  { %462 = vsyncpa [#allocation3], 1 }

</bundles_post_ra>
